<compile_context>
chip_gen: v6e
topology: v6e:2x2x1
jax: 0.10.0
libtpu: 0.0.40
codegen_flags: <defaults>
</compile_context>

<pallas_src>
import math

import jax
import jax.numpy as jnp
from jax.experimental import pallas as pl
from jax.experimental.pallas import tpu as pltpu

_BN_EPS = 1e-5
_LIF_THRESHOLD = 1.0           # snn.Leaky default; beta irrelevant for one step from 0.
_MAX_STEP_BYTES = 6 << 20      # out + a + c per pipeline step (x2 buffers << 16 MiB scoped VMEM)
_XLA_FALLBACK_BYTES = 1 << 20  # below this output size, plain XLA beats pallas_call overhead


def _spike_kernel(delta_ref, a_ref, c_ref, out_ref):
    # delta_ref: (1, 1, L) f32      delta of this batch row, tiled r times along lanes
    # a_ref    : (og_tile, L) f32   folded scale  gamma*inv_std*w[o]
    # c_ref    : (og_tile, L) f32   folded offset b[o] + w[o]*(beta - mean*gamma*inv_std)
    # out_ref  : (1, og_tile, L)    spikes, out dtype
    enc = delta_ref[...] * a_ref[...][None] + c_ref[...][None]      # (1, og_tile, L)
    out_ref[...] = (enc > _LIF_THRESHOLD).astype(out_ref.dtype)


def _round_up(v, m):
    return -(-v // m) * m


def _cdiv(a, b):
    return (a + b - 1) // b


def _pick_og_tile(og, lane_width, out_itemsize, batch):
    """Sublane rows of the (og, lane_width) output view per block.

    Budgets out + a + c blocks (double-buffered) well under every generation's
    scoped-VMEM default, prefers a divisor of `og` (no masked edge tile), and
    guarantees >= 2 grid steps so both v7x TensorCores get work.
    """
    sub = {4: 8, 2: 16, 1: 32}.get(out_itemsize, 8)        # sublane tiling for out dtype
    per_row = lane_width * (out_itemsize + 8)              # out row + a row + c row (f32)
    cap = max(sub, (_MAX_STEP_BYTES // per_row) // sub * sub)
    if og <= cap:
        og_tile = og
    else:
        og_tile = cap
        d = cap
        while d >= sub:                                     # prefer a clean divisor of og
            if og % d == 0:
                og_tile = d
                break
            d -= sub
    if batch * _cdiv(og, og_tile) < 2 and og >= 2 * sub:    # v7x: ensure >= 2 grid steps
        og_tile = min(og_tile, _round_up(_cdiv(og, 2), sub))
    return og_tile


def delta_encoder_forward(x, lin_weight, lin_bias, bn_gamma, bn_beta,
                          *, out_dtype=jnp.float32,
                          xla_fallback_bytes=_XLA_FALLBACK_BYTES):
    """x: (B, T, C). Returns spikes of shape (B, O, C, T) in `out_dtype`.

    out_dtype=bfloat16 (or int8) is lossless for binary spikes and halves
    (quarters) HBM writeback of this store-bound kernel; float32 matches torch.
    """
    x = x.astype(jnp.float32)
    B, T, C = x.shape
    O = int(lin_weight.shape[0])
    CT = C * T
    out_dtype = jnp.dtype(out_dtype)

    # ---- Pass 1 (plain XLA, x-sized): delta + global BatchNorm statistics ----
    xt = jnp.swapaxes(x, 1, 2)                               # (B, C, T)
    diff = xt[:, :, 1:] - xt[:, :, :-1]                      # (B, C, T-1)
    delta = jnp.pad(diff, ((0, 0), (0, 0), (1, 0)))          # delta[..., 0] == 0
    n = B * C * T
    mean = jnp.sum(xt[:, :, -1] - xt[:, :, 0]) / n           # telescoping sum of deltas
    var = jnp.maximum(jnp.sum(jnp.square(diff)) / n - mean * mean, 0.0)
    inv_std = jax.lax.rsqrt(var + _BN_EPS)

    # ---- Fold BN + Linear(1, O) into per-output scale/offset: enc = delta*a + c0 ----
    w = lin_weight.reshape(O).astype(jnp.float32)
    b = lin_bias.reshape(O).astype(jnp.float32)
    gamma = jnp.asarray(bn_gamma, jnp.float32).reshape(())
    beta = jnp.asarray(bn_beta, jnp.float32).reshape(())
    a = gamma * inv_std * w
    c0 = b + w * (beta - mean * gamma * inv_std)

    # ---- Tiny outputs: pallas_call fixed overhead dominates, use plain XLA ----
    if B * O * CT * out_dtype.itemsize < xla_fallback_bytes:
        enc = (delta.reshape(B, 1, C, T) * a.reshape(1, O, 1, 1)
               + c0.reshape(1, O, 1, 1))
        return (enc > _LIF_THRESHOLD).astype(out_dtype)

    # ---- Lane regrouping: r consecutive outputs share one lane row ----
    if CT % 128 == 0:
        r = 1
    else:
        r = (CT * 128 // math.gcd(CT, 128)) // CT            # lcm(CT, 128) / CT
        if r > O or O % r != 0:
            r = 1                                            # masked stores beat pad+slice of O
    OG = O // r
    L = r * CT                                               # lane width per row

    delta_tiled = jnp.tile(delta.reshape(B, 1, CT), (1, 1, r))          # (B, 1, L)
    a_plane = jnp.repeat(a.reshape(OG, r), CT, axis=1)                  # (OG, L)
    c_plane = jnp.repeat(c0.reshape(OG, r), CT, axis=1)                 # (OG, L)

    og_tile = _pick_og_tile(OG, L, out_dtype.itemsize, B)
    grid = (_cdiv(OG, og_tile), B)      # O-tiles outer: a/c planes revisited across B

    out = pl.pallas_call(
        _spike_kernel,
        out_shape=jax.ShapeDtypeStruct((B, OG, L), out_dtype),
        grid=grid,
        in_specs=[
            pl.BlockSpec((1, 1, L), lambda oi, bi: (bi, 0, 0)),          # delta (tiled)
            pl.BlockSpec((og_tile, L), lambda oi, bi: (oi, 0)),          # a plane
            pl.BlockSpec((og_tile, L), lambda oi, bi: (oi, 0)),          # c0 plane
        ],
        out_specs=pl.BlockSpec((1, og_tile, L), lambda oi, bi: (bi, oi, 0)),
        compiler_params=pltpu.CompilerParams(
            dimension_semantics=("parallel", "parallel")),
    )(delta_tiled, a_plane, c_plane)

    # Contiguous reshape only — no transpose of the O x-larger output tensor.
    return out.reshape(B, O, C, T)


def delta_encoder_reference(x, lin_weight, lin_bias, bn_gamma, bn_beta):
    """Pure-JAX mirror of the PyTorch forward. Returns (enc, spikes)."""
    x = x.astype(jnp.float32)
    delta = jnp.zeros_like(x)
    delta = delta.at[:, 1:, :].set(x[:, 1:, :] - x[:, :-1, :])
    d = jnp.transpose(delta[:, None, :, :], (0, 1, 3, 2))               # (B,1,C,T)
    mean = jnp.mean(d)
    var = jnp.mean((d - mean) ** 2)
    d = (d - mean) / jnp.sqrt(var + _BN_EPS) * bn_gamma + bn_beta
    d = jnp.transpose(d, (0, 2, 3, 1))                                  # (B,C,T,1)
    enc = d * lin_weight.reshape(1, 1, 1, -1) + lin_bias.reshape(1, 1, 1, -1)
    enc = jnp.transpose(enc, (0, 3, 1, 2))                              # (B,O,C,T)
    spks = (enc > _LIF_THRESHOLD).astype(jnp.float32)
    return enc, spks


if __name__ == "__main__":
    B, T, C, O = 2, 8, 4, 32   # batch, sequence length, input channels, output_size

    key = jax.random.PRNGKey(0)
    kx, kw, kb = jax.random.split(key, 3)
    x = jax.random.normal(kx, (B, T, C), dtype=jnp.float32)
    # Synthetic parameters (shapes from the module __init__):
    lin_weight = jax.random.normal(kw, (O,), dtype=jnp.float32)         # Linear(1, O).weight[:, 0]
    lin_bias = 0.5 * jax.random.normal(kb, (O,), dtype=jnp.float32)     # Linear(1, O).bias
    bn_gamma = jnp.float32(1.0)   # BatchNorm2d default affine weight
    bn_beta = jnp.float32(0.0)    # BatchNorm2d default affine bias

    # Pallas path (fallback disabled so the kernel actually runs at demo size).
    spk = jax.block_until_ready(delta_encoder_forward(
        x, lin_weight, lin_bias, bn_gamma, bn_beta, xla_fallback_bytes=0))
    # bf16 spikes (lossless 0/1) — halves writeback of the store-bound kernel.
    spk_bf16 = jax.block_until_ready(delta_encoder_forward(
        x, lin_weight, lin_bias, bn_gamma, bn_beta,
        out_dtype=jnp.bfloat16, xla_fallback_bytes=0))
    # Tiny-shape pure-XLA fallback path (default threshold).
    spk_fb = jax.block_until_ready(delta_encoder_forward(
        x, lin_weight, lin_bias, bn_gamma, bn_beta))

    enc_ref, spk_ref = delta_encoder_reference(
        x, lin_weight, lin_bias, bn_gamma, bn_beta)

    assert spk.shape == (B, O, C, T) and spk.dtype == jnp.float32, (spk.shape, spk.dtype)
    assert spk_bf16.shape == (B, O, C, T) and spk_bf16.dtype == jnp.bfloat16
    assert spk_fb.shape == (B, O, C, T)
    # bf16 and f32 kernels make identical spike decisions (cast happens post-compare).
    assert bool(jnp.all(spk_bf16.astype(jnp.float32) == spk))

    # Exact match everywhere the encoded value is not within float-rounding
    # distance of the LIF threshold (folding BN+Linear into a/c0 can move the
    # decision boundary by ~1 ulp); plus a loose global sanity check.
    away_from_boundary = jnp.abs(enc_ref - _LIF_THRESHOLD) > 1e-4
    for s in (spk, spk_bf16.astype(jnp.float32), spk_fb.astype(jnp.float32)):
        assert bool(jnp.all(jnp.where(away_from_boundary, s == spk_ref, True)))
        assert float(jnp.mean(jnp.abs(s - spk_ref))) < 1e-3

    print("KERNEL_OK")
</pallas_src>

<mosaic_0001>
module attributes {stable_mosaic.version = 11 : i64} {
  func.func @_spike_kernel(%arg0: i32, %arg1: i32, %arg2: memref<1x1x128xf32, #tpu.memory_space<vmem>>, %arg3: memref<8x128xf32, #tpu.memory_space<vmem>>, %arg4: memref<8x128xf32, #tpu.memory_space<vmem>>, %arg5: memref<1x8x128xf32, #tpu.memory_space<vmem>>) attributes {dimension_semantics = [#tpu.dimension_semantics<parallel>, #tpu.dimension_semantics<parallel>], iteration_bounds = array<i64: 1, 2>, scalar_prefetch = 0 : i64, scratch_operands = 0 : i64, tpu.core_type = #tpu.core_type<tc>, window_params = [{transform_indices = @transform_0, window_bounds = array<i64: 1, 1, 128>}, {transform_indices = @transform_1, window_bounds = array<i64: 8, 128>}, {transform_indices = @transform_2, window_bounds = array<i64: 8, 128>}, {transform_indices = @transform_3, window_bounds = array<i64: 1, 8, 128>}]} {
    %c0 = arith.constant 0 : index
    %c0_0 = arith.constant 0 : index
    %c0_1 = arith.constant 0 : index
    %0 = vector.load %arg2[%c0, %c0_0, %c0_1] : memref<1x1x128xf32, #tpu.memory_space<vmem>>, vector<1x1x128xf32>
    %c0_2 = arith.constant 0 : index
    %c0_3 = arith.constant 0 : index
    %1 = vector.load %arg3[%c0_2, %c0_3] : memref<8x128xf32, #tpu.memory_space<vmem>>, vector<8x128xf32>
    %2 = vector.shape_cast %1 : vector<8x128xf32> to vector<1x8x128xf32>
    %3 = vector.broadcast %0 : vector<1x1x128xf32> to vector<1x8x128xf32>
    %4 = arith.mulf %3, %2 : vector<1x8x128xf32>
    %c0_4 = arith.constant 0 : index
    %c0_5 = arith.constant 0 : index
    %5 = vector.load %arg4[%c0_4, %c0_5] : memref<8x128xf32, #tpu.memory_space<vmem>>, vector<8x128xf32>
    %6 = vector.shape_cast %5 : vector<8x128xf32> to vector<1x8x128xf32>
    %7 = arith.addf %4, %6 : vector<1x8x128xf32>
    %cst = arith.constant 1.000000e+00 : f32
    %8 = vector.broadcast %cst : f32 to vector<1x8x128xf32>
    %9 = arith.cmpf ogt, %7, %8 : vector<1x8x128xf32>
    %10 = arith.extui %9 : vector<1x8x128xi1> to vector<1x8x128xi32>
    %11 = arith.sitofp %10 : vector<1x8x128xi32> to vector<1x8x128xf32>
    %c0_6 = arith.constant 0 : index
    %c0_7 = arith.constant 0 : index
    %c0_8 = arith.constant 0 : index
    %12 = vector.load %arg5[%c0_6, %c0_7, %c0_8] : memref<1x8x128xf32, #tpu.memory_space<vmem>>, vector<1x8x128xf32>
    tpu.vector_store %arg5[%c0_6, %c0_7, %c0_8], %11 {strides = array<i32>} : memref<1x8x128xf32, #tpu.memory_space<vmem>>, vector<1x8x128xf32>,
    return
  }
  func.func @transform_0(%arg0: i32, %arg1: i32) -> (i32, i32, i32) {
    %c0_i32 = arith.constant 0 : i32
    %c0_i32_0 = arith.constant 0 : i32
    %c0_i32_1 = arith.constant 0 : i32
    return %arg1, %c0_i32, %c0_i32_0 : i32, i32, i32
  }
  func.func @transform_1(%arg0: i32, %arg1: i32) -> (i32, i32) {
    %c0_i32 = arith.constant 0 : i32
    %c0_i32_0 = arith.constant 0 : i32
    return %arg0, %c0_i32 : i32, i32
  }
  func.func @transform_2(%arg0: i32, %arg1: i32) -> (i32, i32) {
    %c0_i32 = arith.constant 0 : i32
    %c0_i32_0 = arith.constant 0 : i32
    return %arg0, %c0_i32 : i32, i32
  }
  func.func @transform_3(%arg0: i32, %arg1: i32) -> (i32, i32, i32) {
    %c0_i32 = arith.constant 0 : i32
    %c0_i32_0 = arith.constant 0 : i32
    return %arg1, %arg0, %c0_i32 : i32, i32, i32
  }
}

</mosaic_0001>

<bundles_post_ra>
// kernel: tpu_custom_call.1
= control target key start
LH: loop header
LB: loop body
LE: loop exit
PB: predicated region body
PF: predicated region fallthrough
CT: control target
= control target key end

     0   :  { %8 = vsyncpa [#allocation3], 0  ;;  %s844_s0 = inlined_call_operand.hbm [shape: f32[2,1,128], index: 0, kind: input, shape index: {}]   ;;  %s845_s1 = inlined_call_operand.hbm [shape: f32[8,128], index: 1, kind: input, shape index: {}]   ;;  %s846_s2 = inlined_call_operand.hbm [shape: f32[8,128], index: 2, kind: input, shape index: {}]   ;;  %s847_s3 = inlined_call_operand.hbm [shape: f32[2,8,128], index: 3, kind: output, shape index: {}]  }
   0x1   :  { %10 = vsyncpa [#allocation3 + $0x1], 0 }
   0x2   :  { %11 = vsyncpa [#allocation6], 0 }
   0x3   :  { %12 = vsyncpa [#allocation4], 0 }
   0x4   :  { %14 = vsyncpa [#allocation4 + $0x1], 0  ;;  %s657_s12 = smov 0   ;;  %s659_s13 = smov 0  }
   0x5   :  { %s661_s14 = smov 0   ;;  %s663_s15 = smov 0  }
   0x6   :  { %s665_s16 = smov 0   ;;  %s667_s17 = smov 0  }
   0x7 LB: > { %s365_s18 = sadd.s32 4294967295, %s630_s17   ;;  %s366_s19 = sadd.s32 4294967294, %s630_s17   ;;  %s630_s17 = sphi %s667_s17, %s20_s17   ;;  %s626_s16 = sphi %s665_s16, %s870_s16   ;;  %s622_s15 = sphi %s663_s15, %s869_s15   ;;  %s618_s14 = sphi %s661_s14, %s868_s14   ;;  %s614_s13 = sphi %s659_s13, %s867_s13   ;;  %s610_s12 = sphi %s657_s12, %s866_s12  }
   0x8   : > { %p52_p0 = scmp.ne.s32.totalorder %s614_s13, %s610_s12  ;;  %p691_p1 = scmp.eq.s32.totalorder %s365_s18, 0 }
   0x9   : > { %p695_p2 = scmp.eq.s32.totalorder %s365_s18, 1  ;;  %p136_p3 = scmp.eq.s32.totalorder %s366_s19, 1 }
   0xa   : > { %s852_s20 = scalar_select %p691_p1, 1, 0 }
   0xb   : > { %s853_s21 = scalar_select %p695_p2, 1, 0 }
   0xc   : > { %p701_p4 = por %p691_p1, %p52_p0  ;;  %p367_p5 = scmp.ge.s32.totalorder %s630_s17, 1 }
   0xd   : > { %p706_p6 = por %p136_p3, %p52_p0  ;;  %p143_p7 = scmp.lt.s32.totalorder %s630_s17, 3 }
   0xe   : > { %s854_s22 = scalar_select %p701_p4, 1, 0 }
   0xf   : > { %s855_s23 = scalar_select %p706_p6, 1, 0 }
  0x10   : > { %p711_p8 = pnand %p367_p5, %p143_p7  ;;  %s632_s25 = smov [#allocation5]  }
  0x11   : > { %s158_s26 = sshll.u32 %s632_s25, 4  ;;  %s633_s27 = smov [#allocation7]   ;;  %s159_s26 = int_to_ptr.vmem [resolvable:$true] %s158_s26 }
  0x12   : > { %s856_s24 = scalar_select %p711_p8, 1, 0 }
  0x13   : > { %p394_p10 = pneg %p711_p8  ;;  %s171_s28 = sshll.u32 %s633_s27, 4  ;;  %s172_s28 = int_to_ptr.vmem [resolvable:$true] %s171_s28 }
  0x14   : > { %s477_s30 = scalar_lea.vmem %s159_s26, 128  ;;  %p485_p5 = scmp.lt.s32.totalorder %s159_s26, %s159_s26 }
  0x15   : > { %p720_p11 = pnand %p394_p10, %p691_p1  ;;  %p478_p13 = scmp.ne.s32.totalorder %s159_s26, %s477_s30 }
  0x16   : > { %p486_p7 = scmp.lt.s32.totalorder %s477_s30, %s477_s30 }
  0x17   : > { %p468_p12 = pneg %p720_p11 }
  0x18   : > { %p487_p9 = por %p486_p7, %p485_p5 }
  0x19   : > { %p480_p0 = pnand %p478_p13, %p468_p12 }
  0x1b   : > { %p481_p3 = pneg %p480_p0 }
  0x1d   : > { %p488_p6 = pnand %p487_p9, %p481_p3 }
  0x1f   : > { %491 = shalt.err (!%p488_p6)
}
  0x20   : > { %397 = dma.hbm_to_vmem [thread:$0]  (!%p720_p11), %s845_s1, 128, %s159_s26, [#allocation6]  }
  0x21   : > { %s503_s6 = scalar_lea.vmem %s172_s28, 128  ;;  %p511_p13 = scmp.lt.s32.totalorder %s172_s28, %s172_s28 }
  0x22   : > { %p504_p10 = scmp.ne.s32.totalorder %s172_s28, %s503_s6  ;;  %p512_p0 = scmp.lt.s32.totalorder %s503_s6, %s503_s6 }
  0x24   : > { %p506_p1 = pnand %p504_p10, %p468_p12  ;;  %p513_p8 = por %p512_p0, %p511_p13 }
  0x26   : > { %p507_p4 = pneg %p506_p1 }
  0x28   : > { %p514_p2 = pnand %p513_p8, %p507_p4 }
  0x2a   : > { %517 = shalt.err (!%p514_p2)
}
  0x2b   : > { %400 = dma.hbm_to_vmem [thread:$0]  (!%p720_p11), %s846_s2, 128, %s172_s28, [#allocation6]  }
  0x2c   : > { %s29_s9 = sadd.s32 1, %s626_s16  ;;  %s39_s10 = sadd.s32 1, %s618_s14 }
  0x2d   : > { %p30_p1 = scmp.ge.s32.totalorder %s29_s9, 2  ;;  %p46_p2 = scmp.ne.s32.totalorder %s618_s14, %s614_s13 }
  0x2e   : > { %p47_p4 = scmp.eq.s32.totalorder %s630_s17, 0  ;;  %p411_p6 = scmp.lt.s32.totalorder %s630_s17, 2 }
  0x2f   : > { %s872_s9 = smov (%p30_p1, %s29_s9), 0  ;;  %p858_p9 = scmp.ne.s32.totalorder %s853_s21, 0 }
  0x30   : > { %p48_p8 = por %p47_p4, %p46_p2  ;;  %s36_s18 = ssub.s32 %s626_s16, %s872_s9 }
  0x31   : > { %p752_p12 = por %p858_p9, %p46_p2  ;;  %s182_s19 = sand.u32 1, %s618_s14  }
  0x32   : > { %p37_p3 = scmp.eq.s32.totalorder %s36_s18, 0  ;;  %s371_s25 = sshll.u32 %s626_s16, 4 }
  0x33   : > { %s190_s29 = scalar_lea.hbm %s844_s0, %s371_s25  ;;  %s185_s30 = scalar_lea.vmem [#allocation2], %s182_s19 }
  0x34   : > { %s761_s26 = scalar_select %p37_p3, %s618_s14, %s39_s10  }
  0x35   : > { %s192_s4 = sshll.u32 %s185_s30, 4  ;;  %p768_p11 = pnand %p411_p6, %p48_p8  ;;  %s193_s4 = int_to_ptr.vmem [resolvable:$true] %s192_s4 }
  0x36   : > { %s183_s5 = scalar_lea.sflag [#allocation3], %s182_s19  ;;  %s531_s6 = scalar_lea.vmem %s193_s4, 16 }
  0x37   : > { %p520_p5 = pneg %p768_p11  ;;  %p532_p7 = scmp.ne.s32.totalorder %s193_s4, %s531_s6 }
  0x38   : > { %s634_s7 = smov [#allocation2]  }
  0x39   : > { %p534_p10 = pnand %p532_p7, %p520_p5  ;;  %s536_s8 = sshll.u32 %s634_s7, 4  ;;  %s537_s8 = int_to_ptr.vmem [resolvable:$false] %s536_s8 }
  0x3a   : > { %s538_s10 = scalar_lea.vmem %s537_s8, 32  ;;  %p539_p0 = scmp.lt.s32.totalorder %s193_s4, %s537_s8 }
  0x3b   : > { %p535_p13 = pneg %p534_p10  ;;  %p540_p1 = scmp.lt.s32.totalorder %s538_s10, %s531_s6 }
  0x3d   : > { %p541_p2 = por %p540_p1, %p539_p0 }
  0x3f   : > { %p542_p4 = pnand %p541_p2, %p535_p13 }
  0x41   : > { %545 = shalt.err (!%p542_p4)
}
  0x42   : > { %404 = dma.hbm_to_vmem [thread:$0]  (!%p768_p11), %s190_s29, 16, %s193_s4, %s183_s5  }
  0x43   : > { %p861_p6 = scmp.ne.s32.totalorder %s856_s24, 0 }
  0x44   : > { %s779_s18 = sand.u32 (!%p861_p6), 1, %s614_s13   ;;  %p862_p8 = scmp.ne.s32.totalorder (!%p861_p6), %s854_s22, 0 }
  0x45   : > { %201 = sbr.rel (%p861_p6) target bundleno = 103 (0x67), region = 32  ;;  %s204_s19 = scalar_lea.sflag (!%p861_p6), [#allocation3], %s779_s18 }
  0x46   : > { %s206_s25 = scalar_lea.vmem (!%p861_p6), [#allocation2], %s779_s18 }
  0x4a   : > { %597 = dma.done.wait (%p862_p8), %s204_s19, 16  }
  0x4b   : > { %599 = vsyncadd (%p862_p8), %s204_s19, 4294967280  ;;  %p863_p9 = scmp.ne.s32.totalorder %s852_s20, 0 }
  0x4d   : > { %601 = dma.done.wait (%p863_p9), [#allocation6], 256  }
  0x4e   : > { %603 = vsyncadd (%p863_p9), [#allocation6], 4294967040  ;;  %s375_s24 = sshll.u32 %s779_s18, 3  ;;  %v376_v0 = vld [vmem:[%s206_s25] ss:$0 sm:$0xff]  ;;  %v237_v1 = vld [vmem:[#allocation5] sm:$0xff] }
  0x4f   : > { %v245_v2 = vld [vmem:[#allocation7] sm:$0xff]  ;;  %v244_v3 = vmul.f32 %v376_v0, %v237_v1  ;;  %s235_s27 = scalar_lea.vmem [#allocation8], %s375_s24  ;;  %s379_s29 = sshll.u32 %s622_s15, 7  ;;  %v635_v5 = vmov 0.0  }
  0x50   : > { %s266_s28 = sshll.u32 %s235_s27, 4  ;;  %s798_s20 = scalar_lea.hbm %s847_s3, %s379_s29  ;;  %s793_s28 = int_to_ptr.vmem [resolvable:$true] %s266_s28 }
  0x51   : > { %v246_v4 = vadd.f32 %v245_v2, %v244_v3  ;;  %s252_s4 = scalar_lea.sflag [#allocation4], %s779_s18  ;;  %s546_s21 = scalar_lea.vmem %s793_s28, 128 }
  0x52   : > { %p547_p3 = scmp.ne.s32.totalorder %s793_s28, %s546_s21  ;;  %s636_s15 = smov [#allocation8]  }
  0x53   : > { %vm247_vm0 = vcmp.gt.f32.partialorder %v246_v4, 1.0  ;;  %s550_s5 = sshll.u32 %s636_s15, 4  ;;  %s551_s5 = int_to_ptr.vmem [resolvable:$false] %s550_s5 }
  0x54   : > { %v377_v6 = vsel %vm247_vm0, 1.0, %v635_v5  ;;  %p548_p11 = pnand %p547_p3, %p752_p12  ;;  %s552_s6 = scalar_lea.vmem %s551_s5, 256 }
  0x55   : > { %250 = vst [vmem:[%s235_s27] sm:$0xff] %v377_v6  ;;  %p553_p7 = scmp.lt.s32.totalorder %s793_s28, %s551_s5  ;;  %p554_p10 = scmp.lt.s32.totalorder %s552_s6, %s546_s21 }
  0x56   : > { %p549_p5 = pneg %p548_p11 }
  0x57   : > { %p555_p13 = por %p554_p10, %p553_p7 }
  0x59   : > { %p556_p0 = pnand %p555_p13, %p549_p5 }
  0x5b   : > { %559 = shalt.err (!%p556_p0)
}
  0x5c   : > { %s560_s7 = scalar_lea.hbm %s798_s20, 128  ;;  %s564_s18 = scalar_lea.hbm %s847_s3, 256 }
  0x5d   : > { %p561_p1 = scmp.ne.s32.totalorder %s798_s20, %s560_s7  ;;  %p565_p6 = scmp.lt.s32.totalorder %s798_s20, %s847_s3 }
  0x5e   : > { %p566_p8 = scmp.lt.s32.totalorder %s564_s18, %s560_s7 }
  0x5f   : > { %p562_p2 = pnand %p561_p1, %p752_p12 }
  0x60   : > { %p567_p9 = por %p566_p8, %p565_p6 }
  0x61   : > { %p563_p4 = pneg %p562_p2 }
  0x63   : > { %p568_p3 = pnand %p567_p9, %p563_p4 }
  0x65   : > { %571 = shalt.err (!%p568_p3)
}
  0x66   : > { %392 = dma.vmem_to_hbm [thread:$0]  (%p752_p12), %s793_s28, 128, %s798_s20, %s252_s4  }
  0x67 PF: > { %s278_s24 = sand.u32 1, %s610_s12   ;;  %p864_p11 = scmp.ne.s32.totalorder %s855_s23, 0 }
  0x68   : > { %p865_p5 = scmp.ge.s32.totalorder %s630_s17, 2  ;;  %s279_s27 = scalar_lea.sflag [#allocation4], %s278_s24 }
  0x6a   : > { %p406_p7 = pnand %p865_p5, %p864_p11 }
  0x6c   : > { %p407_p10 = pneg %p406_p7 }
  0x6e   : > { %605 = dma.done.wait (%p407_p10), %s279_s27, 128  }
  0x6f   : > { %607 = vsyncadd (%p407_p10), %s279_s27, 4294967168  ;;  %s20_s17 = sadd.s32 1, %s630_s17   ;;  %s866_s12 = smov %s614_s13 }
  0x70   : > { %p17_p13 = scmp.ge.s32.totalorder %s20_s17, 4   ;;  %s867_s13 = smov %s618_s14 }
  0x71   : > { %s868_s14 = smov %s761_s26  ;;  %s869_s15 = smov %s626_s16 }
  0x72   : > { %s870_s16 = smov %s872_s9  ;;  %19 = sbr.rel (!%p17_p13) target bundleno = 7 (0x7), region = 87 }
  0x77   :  { %284 = vsyncpa [#allocation3], 1 }
  0x78   :  { %286 = vsyncpa [#allocation3 + $0x1], 1 }
  0x79   :  { %287 = vsyncpa [#allocation6], 1 }
  0x7a   :  { %288 = vsyncpa [#allocation4], 1 }
  0x7b   :  { %290 = vsyncpa [#allocation4 + $0x1], 1 }

</bundles_post_ra>
